<compile_context>
chip_gen: v7x
topology: tpu7x:2x2x1
jax: 0.10.0
libtpu: 0.0.40
codegen_flags: <defaults>
</compile_context>

<pallas_src>
import jax
import jax.numpy as jnp
from jax.experimental import pallas as pl
from jax.experimental.pallas import tpu as pltpu

C = 3        # channels fixed by the module (Conv2d(3, 3, 1))
PAD = 2      # ZeroPad2d(padding=2)
BN_EPS = 1e-5
_LANE = 128
_TP_MAX = 32 * 1024   # lane-tile cap: 3*32K*4B ~= 384 KB per buffer, safe on all gens


def _round_up(v, m):
    return ((v + m - 1) // m) * m


def _fused_pointwise_kernel(a_ref, c_ref, w2_ref, x_ref, o_ref):
    """Fused conv1+BN -> ReLU -> conv2 (bias-free) on a lane-dense [C, TP] slab.

    a_ref : [C, C]  folded conv1 weight  (bn_scale * w1)
    c_ref : [C, 1]  folded conv1 bias    (bn_scale * b1 + bn_shift)
    w2_ref: [C, C]  conv2 weight
    x_ref : [C, TP] input pixels (pixels on the lane axis)
    o_ref : [C, TP] conv2 output WITHOUT its bias (pad + bias handled in wrapper)
    """
    x = x_ref[...]

    # conv1 + folded BN: C broadcasted multiply-adds on the VPU
    # (contraction dim is only 3 -> MXU would be ~3/256 utilized).
    acc = a_ref[:, 0:1] * x[0:1, :]
    for cc in range(1, C):
        acc = acc + a_ref[:, cc:cc + 1] * x[cc:cc + 1, :]
    y = jnp.maximum(acc + c_ref[...], 0.0)

    # conv2 (no bias here).
    z = w2_ref[:, 0:1] * y[0:1, :]
    for cc in range(1, C):
        z = z + w2_ref[:, cc:cc + 1] * y[cc:cc + 1, :]

    o_ref[...] = z.astype(o_ref.dtype)


def scale_equalization_forward(x, w1, b1, bn_scale, bn_shift, w2, b2):
    n, c, h, w = x.shape
    assert c == C

    # Exact fold of eval-mode BatchNorm into conv1.
    a_fold = (bn_scale.reshape(C, 1) * w1).astype(jnp.float32)                       # [C, C]
    c_fold = (bn_scale.reshape(C) * b1.reshape(C) + bn_shift.reshape(C))             # [C]
    c_fold = c_fold.reshape(C, 1).astype(jnp.float32)
    w2f = w2.astype(jnp.float32)

    # Lane-dense slab: all pixels of all images on the lane axis.
    p = n * h * w
    x_slab = jnp.transpose(x, (1, 0, 2, 3)).reshape(C, p).astype(jnp.float32)

    tp = _round_up(p, _LANE) if p <= _TP_MAX else _TP_MAX
    p_pad = _round_up(p, tp)
    if p_pad != p:
        x_slab = jnp.pad(x_slab, ((0, 0), (0, p_pad - p)))

    z_slab = pl.pallas_call(
        _fused_pointwise_kernel,
        out_shape=jax.ShapeDtypeStruct((C, p_pad), jnp.float32),
        grid_spec=pltpu.PrefetchScalarGridSpec(
            num_scalar_prefetch=0,
            grid=(p_pad // tp,),
            in_specs=[
                pl.BlockSpec((C, C), lambda i: (0, 0)),    # folded conv1 weight
                pl.BlockSpec((C, 1), lambda i: (0, 0)),    # folded conv1 bias
                pl.BlockSpec((C, C), lambda i: (0, 0)),    # conv2 weight
                pl.BlockSpec((C, tp), lambda i: (0, i)),   # input pixel slab
            ],
            out_specs=pl.BlockSpec((C, tp), lambda i: (0, i)),
        ),
        compiler_params=pltpu.CompilerParams(
            dimension_semantics=("parallel",),
        ),
    )(a_fold, c_fold, w2f, x_slab)

    # Un-flatten, then apply ZeroPad2d(2)+conv2 composition exactly:
    # zero-pad the bias-free conv2 result spatially and add conv2's bias everywhere.
    z = z_slab[:, :p].reshape(C, n, h, w).transpose(1, 0, 2, 3)
    z = jnp.pad(z, ((0, 0), (0, 0), (PAD, PAD), (PAD, PAD)))
    return z + b2.reshape(1, C, 1, 1)


def make_params(key):
    """Deterministic parameter init mirroring the PyTorch module's shapes."""
    k1, k2, k3, k4, k5 = jax.random.split(key, 5)
    # Conv2d(3,3,1): PyTorch default init U(-1/sqrt(fan_in), 1/sqrt(fan_in)), fan_in = 3
    bound = 1.0 / jnp.sqrt(jnp.float32(C))
    w1 = jax.random.uniform(k1, (C, C), jnp.float32, -bound, bound)   # [Cout, Cin]
    b1 = jax.random.uniform(k2, (C,), jnp.float32, -bound, bound)
    w2 = jax.random.uniform(k3, (C, C), jnp.float32, -bound, bound)
    b2 = jax.random.uniform(k4, (C,), jnp.float32, -bound, bound)
    # bn_weight_change: weight buffer = 10 * rand(C); bias=0, running_mean=0, running_var=1
    bn_weight = 10.0 * jax.random.uniform(k5, (C,), jnp.float32)
    bn_bias = jnp.zeros((C,), jnp.float32)
    running_mean = jnp.zeros((C,), jnp.float32)
    running_var = jnp.ones((C,), jnp.float32)
    bn_scale = bn_weight / jnp.sqrt(running_var + BN_EPS)
    bn_shift = bn_bias - running_mean * bn_scale
    return w1, b1, bn_scale, bn_shift, w2, b2


def reference(x, w1, b1, bn_scale, bn_shift, w2, b2):
    """Pure-JAX reference of the module's forward pass (NCHW)."""
    y = jnp.einsum('oc,nchw->nohw', w1, x) + b1.reshape(1, C, 1, 1)
    y = jnp.maximum(y * bn_scale.reshape(1, C, 1, 1) + bn_shift.reshape(1, C, 1, 1), 0.0)
    y = jnp.pad(y, ((0, 0), (0, 0), (PAD, PAD), (PAD, PAD)))
    z = jnp.einsum('oc,nchw->nohw', w2, y) + b2.reshape(1, C, 1, 1)
    return z


if __name__ == "__main__":
    key = jax.random.PRNGKey(0)
    kx, kp = jax.random.split(key)
    N, H, W = 2, 16, 16
    x = jax.random.normal(kx, (N, C, H, W), jnp.float32)

    w1, b1, bn_scale, bn_shift, w2, b2 = make_params(kp)

    fwd = jax.jit(scale_equalization_forward)
    out = jax.block_until_ready(fwd(x, w1, b1, bn_scale, bn_shift, w2, b2))

    ref = reference(x, w1, b1, bn_scale, bn_shift, w2, b2)
    assert out.shape == (N, C, H + 2 * PAD, W + 2 * PAD)
    max_err = float(jnp.max(jnp.abs(out - ref)))
    assert jnp.allclose(out, ref, rtol=2e-3, atol=2e-3), max_err

    print("KERNEL_OK")
</pallas_src>

<mosaic_0001>
module attributes {stable_mosaic.version = 11 : i64} {
  func.func @_fused_pointwise_kernel(%arg0: i32, %arg1: memref<3x3xf32, #tpu.memory_space<vmem>>, %arg2: memref<3x1xf32, #tpu.memory_space<vmem>>, %arg3: memref<3x3xf32, #tpu.memory_space<vmem>>, %arg4: memref<3x512xf32, #tpu.memory_space<vmem>>, %arg5: memref<3x512xf32, #tpu.memory_space<vmem>>) attributes {dimension_semantics = [#tpu.dimension_semantics<parallel>], iteration_bounds = array<i64: 1>, scalar_prefetch = 0 : i64, scratch_operands = 0 : i64, tpu.core_type = #tpu.core_type<tc>, window_params = [{pipeline_mode = #tpu.pipeline_mode<synchronous>, transform_indices = @transform_0, window_bounds = array<i64: 3, 3>}, {pipeline_mode = #tpu.pipeline_mode<synchronous>, transform_indices = @transform_1, window_bounds = array<i64: 3, 1>}, {pipeline_mode = #tpu.pipeline_mode<synchronous>, transform_indices = @transform_2, window_bounds = array<i64: 3, 3>}, {transform_indices = @transform_3, window_bounds = array<i64: 3, 512>}, {transform_indices = @transform_4, window_bounds = array<i64: 3, 512>}]} {
    %c0 = arith.constant 0 : index
    %c0_0 = arith.constant 0 : index
    %0 = vector.load %arg4[%c0, %c0_0] : memref<3x512xf32, #tpu.memory_space<vmem>>, vector<3x512xf32>
    %c0_1 = arith.constant 0 : index
    %c0_2 = arith.constant 0 : index
    %1 = vector.load %arg1[%c0_1, %c0_2] : memref<3x3xf32, #tpu.memory_space<vmem>>, vector<3x1xf32>
    %2 = vector.extract_strided_slice %0 {offsets = [0, 0], sizes = [1, 512], strides = [1, 1]} : vector<3x512xf32> to vector<1x512xf32>
    %3 = vector.broadcast %1 : vector<3x1xf32> to vector<3x512xf32>
    %4 = vector.broadcast %2 : vector<1x512xf32> to vector<3x512xf32>
    %5 = arith.mulf %3, %4 : vector<3x512xf32>
    %c0_3 = arith.constant 0 : index
    %c1 = arith.constant 1 : index
    %6 = vector.load %arg1[%c0_3, %c1] : memref<3x3xf32, #tpu.memory_space<vmem>>, vector<3x1xf32>
    %7 = vector.extract_strided_slice %0 {offsets = [1, 0], sizes = [1, 512], strides = [1, 1]} : vector<3x512xf32> to vector<1x512xf32>
    %8 = vector.broadcast %6 : vector<3x1xf32> to vector<3x512xf32>
    %9 = vector.broadcast %7 : vector<1x512xf32> to vector<3x512xf32>
    %10 = arith.mulf %8, %9 : vector<3x512xf32>
    %11 = arith.addf %5, %10 : vector<3x512xf32>
    %c0_4 = arith.constant 0 : index
    %c2 = arith.constant 2 : index
    %12 = vector.load %arg1[%c0_4, %c2] : memref<3x3xf32, #tpu.memory_space<vmem>>, vector<3x1xf32>
    %13 = vector.extract_strided_slice %0 {offsets = [2, 0], sizes = [1, 512], strides = [1, 1]} : vector<3x512xf32> to vector<1x512xf32>
    %14 = vector.broadcast %12 : vector<3x1xf32> to vector<3x512xf32>
    %15 = vector.broadcast %13 : vector<1x512xf32> to vector<3x512xf32>
    %16 = arith.mulf %14, %15 : vector<3x512xf32>
    %17 = arith.addf %11, %16 : vector<3x512xf32>
    %c0_5 = arith.constant 0 : index
    %c0_6 = arith.constant 0 : index
    %18 = vector.load %arg2[%c0_5, %c0_6] : memref<3x1xf32, #tpu.memory_space<vmem>>, vector<3x1xf32>
    %19 = vector.broadcast %18 : vector<3x1xf32> to vector<3x512xf32>
    %20 = arith.addf %17, %19 : vector<3x512xf32>
    %cst = arith.constant 0.000000e+00 : f32
    %21 = vector.broadcast %cst : f32 to vector<3x512xf32>
    %22 = arith.maximumf %20, %21 : vector<3x512xf32>
    %c0_7 = arith.constant 0 : index
    %c0_8 = arith.constant 0 : index
    %23 = vector.load %arg3[%c0_7, %c0_8] : memref<3x3xf32, #tpu.memory_space<vmem>>, vector<3x1xf32>
    %24 = vector.extract_strided_slice %22 {offsets = [0, 0], sizes = [1, 512], strides = [1, 1]} : vector<3x512xf32> to vector<1x512xf32>
    %25 = vector.broadcast %23 : vector<3x1xf32> to vector<3x512xf32>
    %26 = vector.broadcast %24 : vector<1x512xf32> to vector<3x512xf32>
    %27 = arith.mulf %25, %26 : vector<3x512xf32>
    %c0_9 = arith.constant 0 : index
    %c1_10 = arith.constant 1 : index
    %28 = vector.load %arg3[%c0_9, %c1_10] : memref<3x3xf32, #tpu.memory_space<vmem>>, vector<3x1xf32>
    %29 = vector.extract_strided_slice %22 {offsets = [1, 0], sizes = [1, 512], strides = [1, 1]} : vector<3x512xf32> to vector<1x512xf32>
    %30 = vector.broadcast %28 : vector<3x1xf32> to vector<3x512xf32>
    %31 = vector.broadcast %29 : vector<1x512xf32> to vector<3x512xf32>
    %32 = arith.mulf %30, %31 : vector<3x512xf32>
    %33 = arith.addf %27, %32 : vector<3x512xf32>
    %c0_11 = arith.constant 0 : index
    %c2_12 = arith.constant 2 : index
    %34 = vector.load %arg3[%c0_11, %c2_12] : memref<3x3xf32, #tpu.memory_space<vmem>>, vector<3x1xf32>
    %35 = vector.extract_strided_slice %22 {offsets = [2, 0], sizes = [1, 512], strides = [1, 1]} : vector<3x512xf32> to vector<1x512xf32>
    %36 = vector.broadcast %34 : vector<3x1xf32> to vector<3x512xf32>
    %37 = vector.broadcast %35 : vector<1x512xf32> to vector<3x512xf32>
    %38 = arith.mulf %36, %37 : vector<3x512xf32>
    %39 = arith.addf %33, %38 : vector<3x512xf32>
    %c0_13 = arith.constant 0 : index
    %c0_14 = arith.constant 0 : index
    %40 = vector.load %arg5[%c0_13, %c0_14] : memref<3x512xf32, #tpu.memory_space<vmem>>, vector<3x512xf32>
    tpu.vector_store %arg5[%c0_13, %c0_14], %39 {strides = array<i32>} : memref<3x512xf32, #tpu.memory_space<vmem>>, vector<3x512xf32>,
    return
  }
  func.func @transform_0(%arg0: i32) -> (i32, i32) {
    %c0_i32 = arith.constant 0 : i32
    %c0_i32_0 = arith.constant 0 : i32
    %c0_i32_1 = arith.constant 0 : i32
    return %c0_i32, %c0_i32_0 : i32, i32
  }
  func.func @transform_1(%arg0: i32) -> (i32, i32) {
    %c0_i32 = arith.constant 0 : i32
    %c0_i32_0 = arith.constant 0 : i32
    %c0_i32_1 = arith.constant 0 : i32
    return %c0_i32, %c0_i32_0 : i32, i32
  }
  func.func @transform_2(%arg0: i32) -> (i32, i32) {
    %c0_i32 = arith.constant 0 : i32
    %c0_i32_0 = arith.constant 0 : i32
    %c0_i32_1 = arith.constant 0 : i32
    return %c0_i32, %c0_i32_0 : i32, i32
  }
  func.func @transform_3(%arg0: i32) -> (i32, i32) {
    %c0_i32 = arith.constant 0 : i32
    %c0_i32_0 = arith.constant 0 : i32
    return %c0_i32, %arg0 : i32, i32
  }
  func.func @transform_4(%arg0: i32) -> (i32, i32) {
    %c0_i32 = arith.constant 0 : i32
    %c0_i32_0 = arith.constant 0 : i32
    return %c0_i32, %arg0 : i32, i32
  }
}

</mosaic_0001>

<bundles_post_ra>
// kernel: scale_equalization_forward.1
= control target key start
LH: loop header
LB: loop body
LE: loop exit
PB: predicated region body
PF: predicated region fallthrough
CT: control target
= control target key end

     0   :  { %v282_v0 = vmov 0   ;;  %v283_v1 = vmov 2   ;;  %v284_v4 = vmov 1   ;;  %v27_v6 = vlaneseq  ;;  %s367_s0 = inlined_call_operand.vmem [shape: f32[3,3], index: 0, kind: input, shape index: {}]   ;;  %s368_s1 = inlined_call_operand.vmem [shape: f32[3,1], index: 1, kind: input, shape index: {}]   ;;  %s369_s2 = inlined_call_operand.vmem [shape: f32[3,3], index: 2, kind: input, shape index: {}]   ;;  %s370_s3 = inlined_call_operand.vmem [shape: f32[3,512], index: 3, kind: input, shape index: {}]   ;;  %s371_s4 = inlined_call_operand.vmem [shape: f32[3,512], index: 4, kind: output, shape index: {}]  }
   0x1   :  { %276 = vset.pattern.permute.xlu0 %v282_v0  ;;  %278 = vset.pattern.permute.xlu1 %v283_v1  ;;  %v19_v2 = vld [vmem:[%s367_s0] sm:$0x7]  ;;  %v18_v11 = vld [vmem:[%s370_s3 + $0x8] sm:$0x77] }
   0x2   :  { %22 = vperm.xlu0 %276, %v19_v2   ;;  %116 = vperm.xlu1 %278, %v19_v2   ;;  %v163_v3 = vld [vmem:[%s368_s1] sm:$0x7]  ;;  %v28_v7 = vshrl.u32 %v27_v6, 7 }
   0x3   :  { %v177_v5 = vld [vmem:[%s369_s2] sm:$0x7] }
   0x4   :  { %v319_v8 = vsub.s32 0, %v28_v7  ;;  %v33_v9 = vsub.s32 4, %v28_v7  ;;  %v17_v10 = vld [vmem:[%s370_s3] sm:$0x77]  ;;  %v327_v12 = vsub.s32 1, %v28_v7  ;;  %v77_v13 = vsub.s32 5, %v28_v7 }
   0x5   :  { %v329_v14 = vsub.s32 2, %v28_v7  ;;  %v125_v15 = vsub.s32 6, %v28_v7 }
   0x6   :  { %277 = vset.pattern.permute.xlu0 %v284_v4  ;;  %279 = vset.pattern.permute.xlu1 %v282_v0  ;;  %v30_v16 = vrot.slane %v17_v10, %v319_v8  ;;  %v34_v17 = vrot.slane %v17_v10, %v33_v9  ;;  %v38_v18 = vrot.slane %v18_v11, %v319_v8 }
   0x7   :  { %68 = vperm.xlu0 %277, %v19_v2   ;;  %166 = vperm.xlu1 %279, %v163_v3   ;;  %v42_v19 = vrot.slane %v18_v11, %v33_v9  ;;  %v74_v20 = vrot.slane %v17_v10, %v327_v12  ;;  %v78_v21 = vrot.slane %v17_v10, %v77_v13 }
   0x8   :  { %v82_v22 = vrot.slane %v18_v11, %v327_v12  ;;  %v86_v23 = vrot.slane %v18_v11, %v77_v13  ;;  %v122_v24 = vrot.slane %v17_v10, %v329_v14  ;;  %v126_v25 = vrot.slane %v17_v10, %v125_v15 }
   0x9   :  { %v130_v26 = vrot.slane %v18_v11, %v329_v14  ;;  %v134_v27 = vrot.slane %v18_v11, %v125_v15  ;;  %v50_v29 = vrot.slane %v30_v16, %v319_v8  ;;  %v54_v30 = vrot.slane %v34_v17, %v319_v8 }
   0xa   :  { %v58_v31 = vrot.slane %v38_v18, %v319_v8  ;;  %v62_v32 = vrot.slane %v42_v19, %v319_v8  ;;  %v94_v33 = vrot.slane %v74_v20, %v327_v12  ;;  %v98_v34 = vrot.slane %v78_v21, %v327_v12 }
   0xb   :  { %204 = vperm.xlu0 %277, %v177_v5   ;;  %180 = vperm.xlu1 %279, %v177_v5   ;;  %v102_v35 = vrot.slane %v82_v22, %v327_v12  ;;  %v106_v36 = vrot.slane %v86_v23, %v327_v12  ;;  %v142_v37 = vrot.slane %v122_v24, %v329_v14 }
   0xc   :  { %v146_v38 = vrot.slane %v126_v25, %v329_v14  ;;  %v150_v39 = vrot.slane %v130_v26, %v329_v14  ;;  %v154_v40 = vrot.slane %v134_v27, %v329_v14 }
   0xf   :  { %280 = vset.pattern.permute.xlu1 %v283_v1  ;;  %281 = vset.pattern.permute.xlu0 %v283_v1 }
  0x10   :  { %232 = vperm.xlu1 %280, %v177_v5  }
  0x81   :  { %v23_v28 = vpop.permute.xlu0 %22  ;;  %v117_v41 = vpop.permute.xlu1 %116 }
  0x82   :  { %v63_v42 = vmul.f32 %v50_v29, %v23_v28  ;;  %v64_v43 = vmul.f32 %v54_v30, %v23_v28  ;;  %v65_v44 = vmul.f32 %v58_v31, %v23_v28  ;;  %v66_v45 = vmul.f32 %v62_v32, %v23_v28 }
  0x83   :  { %v155_v51 = vmul.f32 %v142_v37, %v117_v41  ;;  %v156_v52 = vmul.f32 %v146_v38, %v117_v41  ;;  %v157_v53 = vmul.f32 %v150_v39, %v117_v41  ;;  %v158_v54 = vmul.f32 %v154_v40, %v117_v41 }
  0x86   :  { %v69_v46 = vpop.permute.xlu0 %68  ;;  %v167_v59 = vpop.permute.xlu1 %166 }
  0x87   :  { %v107_v47 = vmul.f32 %v94_v33, %v69_v46  ;;  %v108_v48 = vmul.f32 %v98_v34, %v69_v46  ;;  %v109_v49 = vmul.f32 %v102_v35, %v69_v46  ;;  %v110_v50 = vmul.f32 %v106_v36, %v69_v46 }
  0x89   :  { %v111_v55 = vadd.f32 %v107_v47, %v63_v42  ;;  %v112_v56 = vadd.f32 %v108_v48, %v64_v43  ;;  %v113_v57 = vadd.f32 %v109_v49, %v65_v44  ;;  %v114_v58 = vadd.f32 %v110_v50, %v66_v45 }
  0x8a   :  { %v181_v9 = vpop.permute.xlu1 %180  ;;  %v205_v16 = vpop.permute.xlu0 %204 }
  0x8b   :  { %v159_v60 = vadd.f32 %v155_v51, %v111_v55  ;;  %v160_v61 = vadd.f32 %v156_v52, %v112_v56  ;;  %v161_v62 = vadd.f32 %v157_v53, %v113_v57  ;;  %v162_v63 = vadd.f32 %v158_v54, %v114_v58 }
  0x8d   :  { %v169_v0 = vadd.f32 %v167_v59, %v159_v60  ;;  %v170_v1 = vadd.f32 %v167_v59, %v160_v61  ;;  %v171_v2 = vadd.f32 %v167_v59, %v161_v62  ;;  %v172_v3 = vadd.f32 %v167_v59, %v162_v63 }
  0x8f   :  { %v173_v4 = vmax.f32 %v169_v0, 0.0  ;;  %v174_v5 = vmax.f32 %v170_v1, 0.0  ;;  %v175_v6 = vmax.f32 %v171_v2, 0.0  ;;  %v176_v7 = vmax.f32 %v172_v3, 0.0  ;;  %v233_v29 = vpop.permute.xlu1 %232 }
  0x91   :  { %v210_v10 = vrot.slane %v173_v4, %v327_v12  ;;  %v214_v11 = vrot.slane %v174_v5, %v327_v12  ;;  %v218_v13 = vrot.slane %v175_v6, %v327_v12  ;;  %v222_v15 = vrot.slane %v176_v7, %v327_v12 }
  0x92   :  { %v186_v17 = vrot.slane %v173_v4, %v319_v8  ;;  %v190_v18 = vrot.slane %v174_v5, %v319_v8  ;;  %v194_v19 = vrot.slane %v175_v6, %v319_v8  ;;  %v198_v20 = vrot.slane %v176_v7, %v319_v8 }
  0x93   :  { %v223_v21 = vmul.f32 %v210_v10, %v205_v16  ;;  %v224_v22 = vmul.f32 %v214_v11, %v205_v16  ;;  %v225_v23 = vmul.f32 %v218_v13, %v205_v16  ;;  %v226_v24 = vmul.f32 %v222_v15, %v205_v16 }
  0x94   :  { %v199_v25 = vmul.f32 %v186_v17, %v181_v9  ;;  %v200_v26 = vmul.f32 %v190_v18, %v181_v9  ;;  %v201_v27 = vmul.f32 %v194_v19, %v181_v9  ;;  %v202_v28 = vmul.f32 %v198_v20, %v181_v9 }
  0x95   :  { %v238_v12 = vrot.slane %v173_v4, %v329_v14  ;;  %v242_v30 = vrot.slane %v174_v5, %v329_v14  ;;  %v246_v31 = vrot.slane %v175_v6, %v329_v14  ;;  %v250_v32 = vrot.slane %v176_v7, %v329_v14 }
  0x96   :  { %v227_v33 = vadd.f32 %v223_v21, %v199_v25  ;;  %v228_v34 = vadd.f32 %v224_v22, %v200_v26  ;;  %v229_v8 = vadd.f32 %v225_v23, %v201_v27  ;;  %v230_v35 = vadd.f32 %v226_v24, %v202_v28 }
  0x97   :  { %v251_v36 = vmul.f32 %v238_v12, %v233_v29  ;;  %v252_v37 = vmul.f32 %v242_v30, %v233_v29  ;;  %v253_v38 = vmul.f32 %v246_v31, %v233_v29  ;;  %v254_v39 = vmul.f32 %v250_v32, %v233_v29 }
  0x99   :  { %v255_v40 = vadd.f32 %v251_v36, %v227_v33  ;;  %v256_v41 = vadd.f32 %v252_v37, %v228_v34  ;;  %v257_v42 = vadd.f32 %v253_v38, %v229_v8  ;;  %v258_v43 = vadd.f32 %v254_v39, %v230_v35 }
  0x9b   :  { %v263_v44 = vcombine.low %v255_v40, %v256_v41  ;;  %v264_v45 = vcombine.low %v257_v42, %v258_v43 }
  0x9d   :  { %267 = vst [vmem:[%s371_s4] sm:$0x77] %v263_v44  ;;  %268 = vst [vmem:[%s371_s4 + $0x8] sm:$0x77] %v264_v45 }

</bundles_post_ra>
